<compile_context>
chip_gen: v6e
topology: v6e:2x2x1
jax: 0.10.0
libtpu: 0.0.40
codegen_flags: <defaults>
</compile_context>

<pallas_src>
import functools
import math

import jax
import jax.numpy as jnp
from jax.experimental import pallas as pl
from jax.experimental.pallas import tpu as pltpu


def _round_up(x: int, m: int) -> int:
    return (x + m - 1) // m * m


def _vmem_budget_bytes() -> int:
    """Per-TensorCore VMEM budget, derived from the actual chip generation."""
    try:
        cap = int(pltpu.get_tpu_info().vmem_capacity_bytes)
    except Exception:
        cap = 64 * 1024 * 1024  # conservative fallback: v7x per-TC capacity
    # Use 3/4 of the per-core capacity, capped at 96 MiB:
    #   v5e/v6e (128 MiB physical) -> 96 MiB ; v7x (64 MiB per TC) -> 48 MiB.
    return min((cap // 4) * 3, 96 * 1024 * 1024)


def _overlap_add_kernel(x_ref, o_ref, acc_ref, *, chunk, hop, s_blk, n_chunks):
    """One (row-tile, S-tile) grid step.

    x_ref:   (tile_r, s_blk*chunk) input chunks [sb*s_blk, (sb+1)*s_blk)
    o_ref:   (tile_r, nf_pad)      lane-dense output block (constant over sb)
    acc_ref: (tile_r, nf_pad)      float32 accumulator scratch
    """
    sb = pl.program_id(1)

    @pl.when(sb == 0)
    def _init():
        acc_ref[...] = jnp.zeros_like(acc_ref)

    single_pass = s_blk == n_chunks      # static: whole S handled in this step
    ragged = (n_chunks % s_blk) != 0     # static: last S-tile partially valid

    for j in range(s_blk):
        def _add(j=j):
            x_j = x_ref[:, j * chunk:(j + 1) * chunk].astype(jnp.float32)
            if single_pass:
                # Fully static lane offsets -> plain VMEM read-modify-write.
                acc_ref[:, j * hop:j * hop + chunk] += x_j
            else:
                start = pl.multiple_of((sb * s_blk + j) * hop, hop)
                acc_ref[:, pl.ds(start, chunk)] += x_j

        if ragged:
            # Guard chunks past the end of S on the last (ragged) S-tile.
            pl.when(sb * s_blk + j < n_chunks)(_add)
        else:
            _add()

    @pl.when(sb == pl.num_programs(1) - 1)
    def _store():
        o_ref[...] = acc_ref[...].astype(o_ref.dtype)


@functools.partial(jax.jit, static_argnums=(1, 2))
def overlap_add_1d(x: jax.Array, chunk_size: int, hop_size: int) -> jax.Array:
    """
    Args:
        x: (batch, num_features, S, chunk_size)
    Returns:
        (batch, num_features, n_frames) with n_frames = (S-1)*hop + chunk.
    """
    B, F, S, C = x.shape
    assert C == chunk_size
    n_frames = (S - 1) * hop_size + chunk_size
    rows = B * F
    SC = S * C
    itemsize = jnp.dtype(x.dtype).itemsize

    # Lane-dense output: pad the frame axis to a multiple of 128 (unmasked
    # full-width stores); the pad columns are sliced off after the call.
    nf_pad = _round_up(n_frames, 128)
    # Sublane packing of the I/O dtype: 8 (f32), 16 (bf16), 32 (int8/fp8).
    sublane = max(8, 32 // itemsize)

    # ---- S (reduction-axis) tiling --------------------------------------
    # `unit` = smallest chunk count whose lane width is 128-aligned, keeping
    # tiled input blocks legal (last block dim % 128 == 0, or full width).
    unit = 128 // math.gcd(C, 128)
    if (S <= 256 and SC * itemsize <= 32 * 1024) or S <= unit:
        s_blk = S                          # whole row per step, static offsets
    else:
        target_s = max(1, (8 * 1024) // (C * itemsize))   # ~8 KiB / row / step
        target_s = min(target_s, 32)                      # bound kernel unroll
        s_blk = min(max(unit, (target_s // unit) * unit), S)
    grid_s = pl.cdiv(S, s_blk)

    # ---- Row tiling against a generation-aware VMEM budget ---------------
    budget = _vmem_budget_bytes()
    usable = (budget * 9) // 10            # headroom for Mosaic-internal scratch
    per_row = (2 * s_blk * C * itemsize    # double-buffered input block
               + 2 * nf_pad * itemsize     # double-buffered output block
               + 4 * nf_pad)               # float32 accumulator scratch
    fit_rows = usable // per_row
    if fit_rows < min(rows, sublane):
        # TODO(synk): also tile the accumulator/output over n_frames (an extra
        # frame-tile grid axis) for signals too long for per-TensorCore VMEM.
        raise NotImplementedError(
            "overlap_add_1d: n_frames too large for the per-core VMEM budget")

    if rows <= sublane:
        tile_r = rows                      # single full-extent block (legal)
    else:
        max_tile = min(1024, max(sublane, (fit_rows // sublane) * sublane))
        # Ensure >= 2 row tiles so the "parallel" axis feeds both v7x TCs.
        half_rows = _round_up((rows + 1) // 2, sublane)
        tile_r = min(max_tile, half_rows)
    grid_r = pl.cdiv(rows, tile_r)

    x2 = x.reshape(rows, SC)               # free row-major view; lane-dense DMA

    kernel = functools.partial(
        _overlap_add_kernel, chunk=C, hop=hop_size, s_blk=s_blk, n_chunks=S)

    cost = pl.CostEstimate(
        flops=rows * SC,                   # one f32 add per input element
        transcendentals=0,
        bytes_accessed=(rows * SC + rows * nf_pad) * itemsize,
    )

    out = pl.pallas_call(
        kernel,
        out_shape=jax.ShapeDtypeStruct((rows, nf_pad), x.dtype),
        grid_spec=pltpu.PrefetchScalarGridSpec(
            num_scalar_prefetch=0,
            grid=(grid_r, grid_s),
            in_specs=[pl.BlockSpec((tile_r, s_blk * C), lambda i, s: (i, s))],
            out_specs=pl.BlockSpec((tile_r, nf_pad), lambda i, s: (i, 0)),
            scratch_shapes=[pltpu.VMEM((tile_r, nf_pad), jnp.float32)],
        ),
        compiler_params=pltpu.CompilerParams(
            dimension_semantics=("parallel", "arbitrary"),
            vmem_limit_bytes=budget,
        ),
        cost_estimate=cost,
    )(x2)

    if nf_pad != n_frames:
        out = out[:, :n_frames]
    return out.reshape(B, F, n_frames)


def overlap_add_1d_ref(x: jax.Array, chunk_size: int, hop_size: int) -> jax.Array:
    """Pure-JAX reference (mirrors torch F.fold overlap-add)."""
    B, F, S, C = x.shape
    n_frames = (S - 1) * hop_size + chunk_size
    out = jnp.zeros((B, F, n_frames), jnp.float32)
    for s in range(S):
        out = out.at[:, :, s * hop_size: s * hop_size + C].add(
            x[:, :, s, :].astype(jnp.float32))
    return out.astype(x.dtype)


if __name__ == "__main__":
    # Small deterministic example consistent with the module's forward.
    B, F, S = 2, 4, 8
    chunk_size, hop_size = 16, 8   # n_frames = (8-1)*8 + 16 = 72

    key = jax.random.PRNGKey(0)
    x = jax.random.normal(key, (B, F, S, chunk_size), dtype=jnp.float32)

    y = overlap_add_1d(x, chunk_size, hop_size)
    y = jax.block_until_ready(y)

    y_ref = overlap_add_1d_ref(x, chunk_size, hop_size)
    assert y.shape == (B, F, (S - 1) * hop_size + chunk_size)
    assert jnp.allclose(y, y_ref, atol=1e-5, rtol=1e-5)

    print("KERNEL_OK")
</pallas_src>

<mosaic_0001>
module attributes {stable_mosaic.version = 11 : i64} {
  func.func @_overlap_add_kernel(%arg0: i32, %arg1: i32, %arg2: memref<8x128xf32, #tpu.memory_space<vmem>>, %arg3: memref<8x128xf32, #tpu.memory_space<vmem>>, %arg4: memref<8x128xf32, #tpu.memory_space<vmem>>) attributes {dimension_semantics = [#tpu.dimension_semantics<parallel>, #tpu.dimension_semantics<arbitrary>], iteration_bounds = array<i64: 1, 1>, scalar_prefetch = 0 : i64, scratch_operands = 1 : i64, tpu.core_type = #tpu.core_type<tc>, window_params = [{transform_indices = @transform_0, window_bounds = array<i64: 8, 128>}, {transform_indices = @transform_1, window_bounds = array<i64: 8, 128>}]} {
    %c0_i32 = arith.constant 0 : i32
    %0 = arith.cmpi eq, %arg1, %c0_i32 : i32
    %1 = arith.extui %0 : i1 to i32
    %c0_i32_0 = arith.constant 0 : i32
    %2 = arith.cmpi ne, %1, %c0_i32_0 : i32
    scf.if %2 {
      %cst = arith.constant 0.000000e+00 : f32
      %38 = vector.broadcast %cst : f32 to vector<8x128xf32>
      %c0_39 = arith.constant 0 : index
      %c0_40 = arith.constant 0 : index
      %39 = vector.load %arg4[%c0_39, %c0_40] : memref<8x128xf32, #tpu.memory_space<vmem>>, vector<8x128xf32>
      tpu.vector_store %arg4[%c0_39, %c0_40], %38 {strides = array<i32>} : memref<8x128xf32, #tpu.memory_space<vmem>>, vector<8x128xf32>,
    } else {
    }
    %c0 = arith.constant 0 : index
    %c0_1 = arith.constant 0 : index
    %3 = vector.load %arg2[%c0, %c0_1] : memref<8x128xf32, #tpu.memory_space<vmem>>, vector<8x16xf32>
    %c0_2 = arith.constant 0 : index
    %c0_3 = arith.constant 0 : index
    %4 = vector.load %arg4[%c0_2, %c0_3] : memref<8x128xf32, #tpu.memory_space<vmem>>, vector<8x16xf32>
    %5 = arith.addf %4, %3 : vector<8x16xf32>
    %c0_4 = arith.constant 0 : index
    %c0_5 = arith.constant 0 : index
    %6 = vector.load %arg4[%c0_4, %c0_5] : memref<8x128xf32, #tpu.memory_space<vmem>>, vector<8x16xf32>
    tpu.vector_store %arg4[%c0_4, %c0_5], %5 {strides = array<i32>} : memref<8x128xf32, #tpu.memory_space<vmem>>, vector<8x16xf32>,
    %c0_6 = arith.constant 0 : index
    %c16 = arith.constant 16 : index
    %7 = vector.load %arg2[%c0_6, %c16] : memref<8x128xf32, #tpu.memory_space<vmem>>, vector<8x16xf32>
    %c0_7 = arith.constant 0 : index
    %c8 = arith.constant 8 : index
    %8 = vector.load %arg4[%c0_7, %c8] : memref<8x128xf32, #tpu.memory_space<vmem>>, vector<8x16xf32>
    %9 = arith.addf %8, %7 : vector<8x16xf32>
    %c0_8 = arith.constant 0 : index
    %c8_9 = arith.constant 8 : index
    %10 = vector.load %arg4[%c0_8, %c8_9] : memref<8x128xf32, #tpu.memory_space<vmem>>, vector<8x16xf32>
    tpu.vector_store %arg4[%c0_8, %c8_9], %9 {strides = array<i32>} : memref<8x128xf32, #tpu.memory_space<vmem>>, vector<8x16xf32>,
    %c0_10 = arith.constant 0 : index
    %c32 = arith.constant 32 : index
    %11 = vector.load %arg2[%c0_10, %c32] : memref<8x128xf32, #tpu.memory_space<vmem>>, vector<8x16xf32>
    %c0_11 = arith.constant 0 : index
    %c16_12 = arith.constant 16 : index
    %12 = vector.load %arg4[%c0_11, %c16_12] : memref<8x128xf32, #tpu.memory_space<vmem>>, vector<8x16xf32>
    %13 = arith.addf %12, %11 : vector<8x16xf32>
    %c0_13 = arith.constant 0 : index
    %c16_14 = arith.constant 16 : index
    %14 = vector.load %arg4[%c0_13, %c16_14] : memref<8x128xf32, #tpu.memory_space<vmem>>, vector<8x16xf32>
    tpu.vector_store %arg4[%c0_13, %c16_14], %13 {strides = array<i32>} : memref<8x128xf32, #tpu.memory_space<vmem>>, vector<8x16xf32>,
    %c0_15 = arith.constant 0 : index
    %c48 = arith.constant 48 : index
    %15 = vector.load %arg2[%c0_15, %c48] : memref<8x128xf32, #tpu.memory_space<vmem>>, vector<8x16xf32>
    %c0_16 = arith.constant 0 : index
    %c24 = arith.constant 24 : index
    %16 = vector.load %arg4[%c0_16, %c24] : memref<8x128xf32, #tpu.memory_space<vmem>>, vector<8x16xf32>
    %17 = arith.addf %16, %15 : vector<8x16xf32>
    %c0_17 = arith.constant 0 : index
    %c24_18 = arith.constant 24 : index
    %18 = vector.load %arg4[%c0_17, %c24_18] : memref<8x128xf32, #tpu.memory_space<vmem>>, vector<8x16xf32>
    tpu.vector_store %arg4[%c0_17, %c24_18], %17 {strides = array<i32>} : memref<8x128xf32, #tpu.memory_space<vmem>>, vector<8x16xf32>,
    %c0_19 = arith.constant 0 : index
    %c64 = arith.constant 64 : index
    %19 = vector.load %arg2[%c0_19, %c64] : memref<8x128xf32, #tpu.memory_space<vmem>>, vector<8x16xf32>
    %c0_20 = arith.constant 0 : index
    %c32_21 = arith.constant 32 : index
    %20 = vector.load %arg4[%c0_20, %c32_21] : memref<8x128xf32, #tpu.memory_space<vmem>>, vector<8x16xf32>
    %21 = arith.addf %20, %19 : vector<8x16xf32>
    %c0_22 = arith.constant 0 : index
    %c32_23 = arith.constant 32 : index
    %22 = vector.load %arg4[%c0_22, %c32_23] : memref<8x128xf32, #tpu.memory_space<vmem>>, vector<8x16xf32>
    tpu.vector_store %arg4[%c0_22, %c32_23], %21 {strides = array<i32>} : memref<8x128xf32, #tpu.memory_space<vmem>>, vector<8x16xf32>,
    %c0_24 = arith.constant 0 : index
    %c80 = arith.constant 80 : index
    %23 = vector.load %arg2[%c0_24, %c80] : memref<8x128xf32, #tpu.memory_space<vmem>>, vector<8x16xf32>
    %c0_25 = arith.constant 0 : index
    %c40 = arith.constant 40 : index
    %24 = vector.load %arg4[%c0_25, %c40] : memref<8x128xf32, #tpu.memory_space<vmem>>, vector<8x16xf32>
    %25 = arith.addf %24, %23 : vector<8x16xf32>
    %c0_26 = arith.constant 0 : index
    %c40_27 = arith.constant 40 : index
    %26 = vector.load %arg4[%c0_26, %c40_27] : memref<8x128xf32, #tpu.memory_space<vmem>>, vector<8x16xf32>
    tpu.vector_store %arg4[%c0_26, %c40_27], %25 {strides = array<i32>} : memref<8x128xf32, #tpu.memory_space<vmem>>, vector<8x16xf32>,
    %c0_28 = arith.constant 0 : index
    %c96 = arith.constant 96 : index
    %27 = vector.load %arg2[%c0_28, %c96] : memref<8x128xf32, #tpu.memory_space<vmem>>, vector<8x16xf32>
    %c0_29 = arith.constant 0 : index
    %c48_30 = arith.constant 48 : index
    %28 = vector.load %arg4[%c0_29, %c48_30] : memref<8x128xf32, #tpu.memory_space<vmem>>, vector<8x16xf32>
    %29 = arith.addf %28, %27 : vector<8x16xf32>
    %c0_31 = arith.constant 0 : index
    %c48_32 = arith.constant 48 : index
    %30 = vector.load %arg4[%c0_31, %c48_32] : memref<8x128xf32, #tpu.memory_space<vmem>>, vector<8x16xf32>
    tpu.vector_store %arg4[%c0_31, %c48_32], %29 {strides = array<i32>} : memref<8x128xf32, #tpu.memory_space<vmem>>, vector<8x16xf32>,
    %c0_33 = arith.constant 0 : index
    %c112 = arith.constant 112 : index
    %31 = vector.load %arg2[%c0_33, %c112] : memref<8x128xf32, #tpu.memory_space<vmem>>, vector<8x16xf32>
    %c0_34 = arith.constant 0 : index
    %c56 = arith.constant 56 : index
    %32 = vector.load %arg4[%c0_34, %c56] : memref<8x128xf32, #tpu.memory_space<vmem>>, vector<8x16xf32>
    %33 = arith.addf %32, %31 : vector<8x16xf32>
    %c0_35 = arith.constant 0 : index
    %c56_36 = arith.constant 56 : index
    %34 = vector.load %arg4[%c0_35, %c56_36] : memref<8x128xf32, #tpu.memory_space<vmem>>, vector<8x16xf32>
    tpu.vector_store %arg4[%c0_35, %c56_36], %33 {strides = array<i32>} : memref<8x128xf32, #tpu.memory_space<vmem>>, vector<8x16xf32>,
    %c0_i32_37 = arith.constant 0 : i32
    %35 = arith.cmpi eq, %arg1, %c0_i32_37 : i32
    %36 = arith.extui %35 : i1 to i32
    %c0_i32_38 = arith.constant 0 : i32
    %37 = arith.cmpi ne, %36, %c0_i32_38 : i32
    scf.if %37 {
      %c0_39 = arith.constant 0 : index
      %c0_40 = arith.constant 0 : index
      %38 = vector.load %arg4[%c0_39, %c0_40] : memref<8x128xf32, #tpu.memory_space<vmem>>, vector<8x128xf32>
      %c0_41 = arith.constant 0 : index
      %c0_42 = arith.constant 0 : index
      %39 = vector.load %arg3[%c0_41, %c0_42] : memref<8x128xf32, #tpu.memory_space<vmem>>, vector<8x128xf32>
      tpu.vector_store %arg3[%c0_41, %c0_42], %38 {strides = array<i32>} : memref<8x128xf32, #tpu.memory_space<vmem>>, vector<8x128xf32>,
    } else {
    }
    return
  }
  func.func @transform_0(%arg0: i32, %arg1: i32) -> (i32, i32) {
    %c0_i32 = arith.constant 0 : i32
    return %arg0, %arg1 : i32, i32
  }
  func.func @transform_1(%arg0: i32, %arg1: i32) -> (i32, i32) {
    %c0_i32 = arith.constant 0 : i32
    %c0_i32_0 = arith.constant 0 : i32
    return %arg0, %c0_i32 : i32, i32
  }
}

</mosaic_0001>

<bundles_post_ra>
// kernel: overlap_add_1d.1
= control target key start
LH: loop header
LB: loop body
LE: loop exit
PB: predicated region body
PF: predicated region fallthrough
CT: control target
= control target key end

     0   :  { %vm17_vm0 = vcmask 130048   ;;  %s132_s8 = smov 120   ;;  %v133_v1 = vmov 0.0   ;;  %s157_s0 = inlined_call_operand.vmem [shape: f32[8,128], index: 0, kind: input, shape index: {}]   ;;  %s158_s1 = inlined_call_operand.hbm [shape: f32[8,128], index: 1, kind: output, shape index: {}]  }
   0x1   :  { %v19_v0 = vld [vmem:[%s157_s0] sm:$0xff]  ;;  %13 = vst [vmem:[#allocation2] sm:$0xff] %v133_v1 }
   0x2   :  { %22 = vrot.lane.b32.xlu0 %v19_v0, %s132_s8 }
   0x3   :  { %6 = vsyncpa [#allocation4], 0  ;;  %s134_s9 = smov 104   ;;  %18 = vst.msk [vmem:[#allocation2] sm:$0xff] %vm17_vm0, %v19_v0  ;;  %s135_s10 = smov 112   ;;  %vm26_vm1 = vcmask 195648  }
   0x4   :  { %40 = vrot.lane.b32.xlu1 %v19_v0, %s134_s9  ;;  %s136_s11 = smov 96   ;;  %s137_s12 = smov 88   ;;  %vm35_vm2 = vcmask 261248   ;;  %vm44_vm3 = vcmask 326848   ;;  %vm53_vm4 = vcmask 392448   ;;  %vm62_vm5 = vcmask 458048  }
   0x5   :  { %s138_s13 = smov 80   ;;  %s139_s14 = smov 72   ;;  %vm71_vm6 = vcmask 523648   ;;  %vm80_vm7 = vcmask 589248  }
   0x6   :  { %31 = vrot.lane.b32.xlu0 %v19_v0, %s135_s10  ;;  %s140_s0 = smov [#allocation3]  }
   0x7   :  { %s93_s15 = sshll.u32 %s140_s0, 4  ;;  %s94_s15 = int_to_ptr.vmem [resolvable:$true] %s93_s15 }
   0x8   :  { %49 = vrot.lane.b32.xlu1 %v19_v0, %s136_s11  ;;  %s110_s16 = scalar_lea.vmem %s94_s15, 128  ;;  %p115_p1 = scmp.lt.s32.totalorder %s94_s15, %s94_s15 }
   0x9   :  { %p111_p0 = scmp.ne.s32.totalorder %s94_s15, %s110_s16  ;;  %p116_p2 = scmp.lt.s32.totalorder %s110_s16, %s110_s16 }
   0xa   :  { %58 = vrot.lane.b32.xlu0 %v19_v0, %s137_s12  ;;  %v20_v2 = vld [vmem:[#allocation2] sm:$0xff] }
   0xb   :  { %p117_p3 = por %p116_p2, %p115_p1 }
   0xc   :  { %67 = vrot.lane.b32.xlu1 %v19_v0, %s138_s13 }
   0xd   :  { %p118_p4 = pnand %p117_p3, %p111_p0 }
   0xe   :  { %76 = vrot.lane.b32.xlu0 %v19_v0, %s139_s14 }
  0x74   :  { %v23_v3 = vpop.permute.xlu0 %22 }
  0x75   :  { %v25_v4 = vadd.f32 %v23_v3, %v20_v2 }
  0x76   :  { %v41_v8 = vpop.permute.xlu1 %40 }
  0x77   :  { %27 = vst.msk [vmem:[#allocation2] sm:$0xff] %vm26_vm1, %v25_v4 }
  0x78   :  { %v32_v5 = vpop.permute.xlu0 %31 }
  0x7a   :  { %v50_v11 = vpop.permute.xlu1 %49 }
  0x7c   :  { %v59_v14 = vpop.permute.xlu0 %58 }
  0x7e   :  { %v29_v6 = vld [vmem:[#allocation2] sm:$0xff]  ;;  %v68_v17 = vpop.permute.xlu1 %67 }
  0x7f   :  { %v34_v7 = vadd.f32 %v32_v5, %v29_v6 }
  0x80   :  { %v77_v20 = vpop.permute.xlu0 %76 }
  0x81   :  { %36 = vst.msk [vmem:[#allocation2] sm:$0xff] %vm35_vm2, %v34_v7 }
  0x88   :  { %v38_v9 = vld [vmem:[#allocation2] sm:$0xff] }
  0x89   :  { %v43_v10 = vadd.f32 %v41_v8, %v38_v9 }
  0x8b   :  { %45 = vst.msk [vmem:[#allocation2] sm:$0xff] %vm44_vm3, %v43_v10 }
  0x92   :  { %v47_v12 = vld [vmem:[#allocation2] sm:$0xff] }
  0x93   :  { %v52_v13 = vadd.f32 %v50_v11, %v47_v12 }
  0x95   :  { %54 = vst.msk [vmem:[#allocation2] sm:$0xff] %vm53_vm4, %v52_v13 }
  0x9c   :  { %v56_v15 = vld [vmem:[#allocation2] sm:$0xff] }
  0x9d   :  { %v61_v16 = vadd.f32 %v59_v14, %v56_v15 }
  0x9f   :  { %63 = vst.msk [vmem:[#allocation2] sm:$0xff] %vm62_vm5, %v61_v16 }
  0xa6   :  { %v65_v18 = vld [vmem:[#allocation2] sm:$0xff] }
  0xa7   :  { %v70_v19 = vadd.f32 %v68_v17, %v65_v18 }
  0xa9   :  { %72 = vst.msk [vmem:[#allocation2] sm:$0xff] %vm71_vm6, %v70_v19 }
  0xb0   :  { %v74_v21 = vld [vmem:[#allocation2] sm:$0xff] }
  0xb1   :  { %v79_v22 = vadd.f32 %v77_v20, %v74_v21 }
  0xb3   :  { %81 = vst.msk [vmem:[#allocation2] sm:$0xff] %vm80_vm7, %v79_v22 }
  0xba   :  { %v85_v23 = vld [vmem:[#allocation2] sm:$0xff] }
  0xbb   :  { %86 = vst [vmem:[#allocation3] sm:$0xff] %v85_v23 }
  0xbc   :  { %121 = shalt.err (!%p118_p4)
}
  0xbd   :  { %96 = dma.vmem_to_hbm [thread:$0]  %s94_s15, 128, %s158_s1, [#allocation4]  }
  0xbe   :  { %130 = dma.done.wait [#allocation4], 128  }
  0xbf   :  { %131 = vsyncadd [#allocation4], 4294967168 }
  0xc0   :  { %100 = vsyncpa [#allocation4], 1 }

</bundles_post_ra>
